<compile_context>
chip_gen: v7x
topology: tpu7x:2x2x1
jax: 0.10.0
libtpu: 0.0.40
codegen_flags: <defaults>
</compile_context>

<pallas_src>
import math

import jax
import jax.numpy as jnp
from jax.experimental import pallas as pl
from jax.experimental.pallas import tpu as pltpu


def _make_pos_enc(seq_len: int, d_model: int) -> jnp.ndarray:
    """Sinusoidal positional-encoding buffer (1, seq_len, d_model), matching
    the PyTorch __init__ exactly (even cols = sin, odd cols = cos)."""
    pos = jnp.arange(seq_len, dtype=jnp.float32)[:, None]                  # (S, 1)
    denom = jnp.exp(
        jnp.arange(0, d_model, 2, dtype=jnp.float32) * (-math.log(10000.0) / d_model)
    )                                                                       # (D/2,)
    angles = pos * denom                                                    # (S, D/2)
    pe = jnp.stack([jnp.sin(angles), jnp.cos(angles)], axis=-1).reshape(seq_len, d_model)
    return pe[None, :, :]                                                   # (1, S, D)


def _choose_col_tile(total_cols: int, rows: int, itemsize: int,
                     target_bytes: int = 2 << 20) -> int:
    """Pick a lane-dense column tile (multiple of 128) that divides total_cols,
    keeps each x/out buffer <= ~target_bytes, and (when possible) yields >= 2
    grid steps so v7x's two TensorCores both get work."""
    if total_cols % 128 != 0:
        # Full width equals the full array dim -> always a legal block shape.
        return total_cols
    max_cols_budget = max(128, (target_bytes // max(rows * itemsize, 1)) // 128 * 128)
    max_cols_split = max(128, (total_cols // 2) // 128 * 128)
    tc = min(total_cols, max_cols_budget, max_cols_split)
    # Shrink to an exact divisor of total_cols so every tile is full/unmasked.
    while tc > 128 and total_cols % tc != 0:
        tc -= 128
    if total_cols % tc != 0:
        tc = total_cols
    return tc


def _add_pe_kernel(x_ref, pe_ref, o_ref):
    # x_ref/o_ref: (B, tc) tile of the flattened activations.
    # pe_ref:      (1, tc) tile of the flattened PE, broadcast over batch.
    x = x_ref[...].astype(jnp.float32)
    pe = pe_ref[...].astype(jnp.float32)
    o_ref[...] = (x + pe).astype(o_ref.dtype)


def positional_encoding_forward(x: jnp.ndarray, pos_enc: jnp.ndarray) -> jnp.ndarray:
    """x: (B, S, D); pos_enc: (1, S_full, D) with S_full >= S."""
    B, S, D = x.shape
    # Slice like posEnc[:, :x.shape[1], :] (skipped when already exact-length).
    pe = pos_enc if pos_enc.shape[1] == S else pos_enc[:, :S, :]
    pe = pe.astype(x.dtype)

    cols = S * D
    itemsize = jnp.dtype(x.dtype).itemsize

    # Lane-dense 2D views (row-major reshapes: no data movement).
    x2d = x.reshape(B, cols)
    pe2d = pe.reshape(1, cols)

    tc = _choose_col_tile(cols, B, itemsize)
    grid = (cols // tc,)

    cost = pl.CostEstimate(
        flops=B * cols,
        transcendentals=0,
        bytes_accessed=(2 * B * cols + cols) * itemsize,  # x in + out + PE once
    )

    out2d = pl.pallas_call(
        _add_pe_kernel,
        out_shape=jax.ShapeDtypeStruct((B, cols), x.dtype),
        grid_spec=pltpu.PrefetchScalarGridSpec(
            num_scalar_prefetch=0,
            grid=grid,
            in_specs=[
                pl.BlockSpec((B, tc), lambda j: (0, j)),   # activations
                pl.BlockSpec((1, tc), lambda j: (0, j)),   # PE (batch-broadcast)
            ],
            out_specs=pl.BlockSpec((B, tc), lambda j: (0, j)),
        ),
        compiler_params=pltpu.CompilerParams(
            dimension_semantics=("parallel",),
        ),
        cost_estimate=cost,
    )(x2d, pe2d)

    return out2d.reshape(B, S, D)


if __name__ == "__main__":
    # Small shapes consistent with the module: batch=2, seq=8, d_model=32.
    B, SEQ_LEN, D_MODEL = 2, 8, 32

    key = jax.random.PRNGKey(0)
    x = jax.random.normal(key, (B, SEQ_LEN, D_MODEL), dtype=jnp.float32)
    pos_enc = _make_pos_enc(SEQ_LEN, D_MODEL)

    out = jax.block_until_ready(positional_encoding_forward(x, pos_enc))

    # Sanity check against plain-JAX reference.
    ref = x + pos_enc[:, :SEQ_LEN, :]
    assert out.shape == (B, SEQ_LEN, D_MODEL)
    assert jnp.allclose(out, ref, atol=1e-6, rtol=1e-6), "mismatch vs reference"

    print("KERNEL_OK")
</pallas_src>

<mosaic_0001>
module attributes {stable_mosaic.version = 11 : i64} {
  func.func @_add_pe_kernel(%arg0: i32, %arg1: memref<2x128xf32, #tpu.memory_space<vmem>>, %arg2: memref<1x128xf32, #tpu.memory_space<vmem>>, %arg3: memref<2x128xf32, #tpu.memory_space<vmem>>) attributes {dimension_semantics = [#tpu.dimension_semantics<parallel>], iteration_bounds = array<i64: 2>, scalar_prefetch = 0 : i64, scratch_operands = 0 : i64, tpu.core_type = #tpu.core_type<tc>, window_params = [{transform_indices = @transform_0, window_bounds = array<i64: 2, 128>}, {transform_indices = @transform_1, window_bounds = array<i64: 1, 128>}, {transform_indices = @transform_2, window_bounds = array<i64: 2, 128>}]} {
    %c0 = arith.constant 0 : index
    %c0_0 = arith.constant 0 : index
    %0 = vector.load %arg1[%c0, %c0_0] : memref<2x128xf32, #tpu.memory_space<vmem>>, vector<2x128xf32>
    %c0_1 = arith.constant 0 : index
    %c0_2 = arith.constant 0 : index
    %1 = vector.load %arg2[%c0_1, %c0_2] : memref<1x128xf32, #tpu.memory_space<vmem>>, vector<1x128xf32>
    %2 = vector.broadcast %1 : vector<1x128xf32> to vector<2x128xf32>
    %3 = arith.addf %0, %2 : vector<2x128xf32>
    %c0_3 = arith.constant 0 : index
    %c0_4 = arith.constant 0 : index
    %4 = vector.load %arg3[%c0_3, %c0_4] : memref<2x128xf32, #tpu.memory_space<vmem>>, vector<2x128xf32>
    tpu.vector_store %arg3[%c0_3, %c0_4], %3 {strides = array<i32>} : memref<2x128xf32, #tpu.memory_space<vmem>>, vector<2x128xf32>,
    return
  }
  func.func @transform_0(%arg0: i32) -> (i32, i32) {
    %c0_i32 = arith.constant 0 : i32
    %c0_i32_0 = arith.constant 0 : i32
    return %c0_i32, %arg0 : i32, i32
  }
  func.func @transform_1(%arg0: i32) -> (i32, i32) {
    %c0_i32 = arith.constant 0 : i32
    %c0_i32_0 = arith.constant 0 : i32
    return %c0_i32, %arg0 : i32, i32
  }
  func.func @transform_2(%arg0: i32) -> (i32, i32) {
    %c0_i32 = arith.constant 0 : i32
    %c0_i32_0 = arith.constant 0 : i32
    return %c0_i32, %arg0 : i32, i32
  }
}

</mosaic_0001>

<bundles_post_ra>
// kernel: tpu_custom_call.1
= control target key start
LH: loop header
LB: loop body
LE: loop exit
PB: predicated region body
PF: predicated region fallthrough
CT: control target
= control target key end

     0   :  { %7 = vsyncpa [#allocation3], 0  ;;  %s616_s0 = inlined_call_operand.hbm [shape: f32[2,256], index: 0, kind: input, shape index: {}]   ;;  %s617_s1 = inlined_call_operand.vmem [shape: f32[1,256], index: 1, kind: input, shape index: {}]   ;;  %s618_s2 = inlined_call_operand.hbm [shape: f32[2,256], index: 2, kind: output, shape index: {}]  }
   0x1   :  { %9 = vsyncpa [#allocation3 + $0x1], 0 }
   0x2   :  { %10 = vsyncpa [#allocation4], 0 }
   0x3   :  { %12 = vsyncpa [#allocation4 + $0x1], 0  ;;  %s450_s9 = smov 0   ;;  %s452_s10 = smov 0  }
   0x4   :  { %s454_s11 = smov 0   ;;  %s456_s12 = smov 0  }
   0x5 LB: > { %s471_s13 = sadd.s32 4294967295, %s431_s12   ;;  %s276_s14 = sadd.s32 4294967294, %s431_s12   ;;  %s431_s12 = sphi %s456_s12, %s633_s12   ;;  %s427_s11 = sphi %s454_s11, %s632_s11   ;;  %s423_s10 = sphi %s452_s10, %s631_s10   ;;  %s419_s9 = sphi %s450_s9, %s630_s9  }
   0x6   : > { %s475_s15 = sadd.s32 1, %s431_s12   ;;  %s25_s16 = sadd.s32 1, %s427_s11 }
   0x7   : > { %s22_s17 = ssub.s32 %s431_s12, %s475_s15  ;;  %p32_p0 = scmp.ne.s32.totalorder %s427_s11, %s423_s10 }
   0x8   : > { %p23_p1 = scmp.eq.s32.totalorder %s22_s17, 0  ;;  %p33_p2 = scmp.eq.s32.totalorder %s431_s12, 0 }
   0x9   : > { %p38_p3 = scmp.ne.s32.totalorder %s423_s10, %s419_s9  ;;  %p39_p4 = scmp.eq.s32.totalorder %s471_s13, 0 }
   0xa   : > { %s487_s18 = scalar_select %p23_p1, %s427_s11, %s25_s16  }
   0xb   : > { %p489_p5 = por %p33_p2, %p32_p0  ;;  %p493_p6 = por %p39_p4, %p38_p3 }
   0xc   : > { %p88_p7 = scmp.eq.s32.totalorder %s471_s13, 1  ;;  %p94_p8 = scmp.eq.s32.totalorder %s276_s14, 1 }
   0xd   : > { %p301_p10 = scmp.lt.s32.totalorder %s431_s12, 2  ;;  %s114_s23 = sand.u32 1, %s427_s11  }
   0xe   : > { %p500_p11 = por %p88_p7, %p32_p0  ;;  %p504_p12 = por %p94_p8, %p38_p3 }
   0xf   : > { %s280_s24 = sshll.u32 %s431_s12, 5  ;;  %s279_s25 = sshll.u32 %s114_s23, 1 }
  0x10   : > { %s622_s21 = scalar_select %p500_p11, 1, 0 }
  0x11   : > { %s623_s22 = scalar_select %p504_p12, 1, 0 }
  0x12   : > { %s513_s28 = scalar_lea.hbm %s616_s0, %s280_s24  ;;  %s118_s29 = scalar_lea.vmem [#allocation2], %s279_s25 }
  0x13   : > { %s125_s30 = sshll.u32 %s118_s29, 4  ;;  %p517_p13 = pnand %p301_p10, %p489_p5  ;;  %s521_s30 = int_to_ptr.vmem [resolvable:$true] %s125_s30 }
  0x14   : > { %s115_s4 = scalar_lea.sflag [#allocation3], %s114_s23  ;;  %s335_s5 = scalar_lea.hbm %s513_s28, 32 }
  0x15   : > { %p336_p2 = scmp.ne.s32.totalorder %s513_s28, %s335_s5  ;;  %p337_p3 = pneg %p517_p13 }
  0x16   : > { %s340_s8 = scalar_lea.hbm %s616_s0, 64  ;;  %p341_p5 = scmp.lt.u32.totalorder %s513_s28, %s616_s0 }
  0x17   : > { %p338_p4 = pnand %p337_p3, %p336_p2  ;;  %p342_p8 = scmp.lt.u32.totalorder %s340_s8, %s335_s5 }
  0x18   : > { %p344_p9 = scmp.lt.u32.totalorder %s335_s5, %s513_s28 }
  0x19   : > { %p339_p7 = pneg %p338_p4  ;;  %p343_p10 = por %p342_p8, %p341_p5 }
  0x1b   : > { %p345_p0 = por %p344_p9, %p343_p10 }
  0x1d   : > { %p346_p1 = pnand %p345_p0, %p339_p7 }
  0x1f   : > { %349 = shalt.err (!%p346_p1)
}
  0x20   : > { %s350_s17 = scalar_lea.vmem %s521_s30, 32  ;;  %s433_s19 = smov [#allocation2]  }
  0x21   : > { %p351_p2 = scmp.ne.s32.totalorder %s521_s30, %s350_s17  ;;  %s355_s23 = sshll.u32 %s433_s19, 4  ;;  %s356_s23 = int_to_ptr.vmem [resolvable:$false] %s355_s23 }
  0x22   : > { %s357_s24 = scalar_lea.vmem %s356_s23, 64  ;;  %p358_p11 = scmp.lt.s32.totalorder %s521_s30, %s356_s23 }
  0x23   : > { %p353_p4 = pnand %p351_p2, %p337_p3  ;;  %p359_p5 = scmp.lt.s32.totalorder %s357_s24, %s350_s17 }
  0x25   : > { %p354_p12 = pneg %p353_p4  ;;  %p360_p8 = por %p359_p5, %p358_p11 }
  0x27   : > { %p361_p9 = pnand %p360_p8, %p354_p12 }
  0x29   : > { %364 = shalt.err (!%p361_p9)
}
  0x2a   : > { %296 = dma.hbm_to_vmem [thread:$0]  (!%p517_p13), %s513_s28, 32, %s521_s30, %s115_s4  }
  0x2b   : > { %p625_p0 = scmp.lt.s32.totalorder %s431_s12, 3  ;;  %p626_p1 = scmp.ge.s32.totalorder %s431_s12, 1 }
  0x2d   : > { %p137_p3 = pnand %p626_p1, %p625_p0 }
  0x2e   : > { %s555_s25 = sand.u32 (!%p137_p3), 1, %s423_s10  }
  0x2f   : > { %140 = sbr.rel (%p137_p3) target bundleno = 83 (0x53), region = 28  ;;  %s282_s26 = sshll.u32 (!%p137_p3), %s555_s25, 1 }
  0x30   : > { %s143_s27 = scalar_lea.sflag (!%p137_p3), [#allocation3], %s555_s25  ;;  %s146_s29 = scalar_lea.vmem (!%p137_p3), [#allocation2], %s282_s26 }
  0x36   : > { %410 = dma.done.wait (%p493_p6), %s143_s27, 32  }
  0x37   : > { %412 = vsyncadd (%p493_p6), %s143_s27, 4294967264  ;;  %p170_p11 = scmp.lt.s32.totalorder %s471_s13, 1  ;;  %s169_s5 = scalar_lea.vmem [#allocation5], %s282_s26  ;;  %v173_v0 = vld [vmem:[%s146_s29] sm:$0x3] }
  0x38   : > { %s197_s6 = sshll.u32 %s169_s5, 4  ;;  %s286_s7 = sshll.u32 %s471_s13, 5  ;;  %s569_s6 = int_to_ptr.vmem [resolvable:$true] %s197_s6 }
  0x39   : > { %s171_s28 = scalar_select %p170_p11, %s471_s13, 1 }
  0x3a   : > { %s574_s14 = scalar_lea.hbm %s618_s2, %s286_s7  ;;  %s184_s16 = scalar_lea.sflag [#allocation4], %s555_s25 }
  0x3b   : > { %s172_s4 = scalar_lea.vmem %s617_s1, %s171_s28  ;;  %s365_s17 = scalar_lea.vmem %s569_s6, 32 }
  0x3c   : > { %v284_v1 = vld [vmem:[%s172_s4] ss:$0 sm:$0xff]  ;;  %p366_p6 = scmp.ne.s32.totalorder %s569_s6, %s365_s17  ;;  %p627_p12 = scmp.ne.s32.totalorder %s622_s21, 0 }
  0x3d   : > { %v181_v2 = vadd.f32 %v284_v1, %v173_v0  ;;  %s434_s13 = smov [#allocation5]  }
  0x3e   : > { %p367_p13 = pnand %p366_p6, %p627_p12  ;;  %s369_s19 = sshll.u32 %s434_s13, 4  ;;  %s370_s19 = int_to_ptr.vmem [resolvable:$false] %s369_s19 }
  0x3f   : > { %182 = vst [vmem:[%s169_s5] sm:$0x3] %v181_v2  ;;  %s371_s23 = scalar_lea.vmem %s370_s19, 64  ;;  %p372_p10 = scmp.lt.s32.totalorder %s569_s6, %s370_s19 }
  0x40   : > { %p368_p7 = pneg %p367_p13  ;;  %p373_p2 = scmp.lt.s32.totalorder %s371_s23, %s365_s17 }
  0x42   : > { %p374_p4 = por %p373_p2, %p372_p10 }
  0x44   : > { %p375_p5 = pnand %p374_p4, %p368_p7 }
  0x46   : > { %378 = shalt.err (!%p375_p5)
}
  0x47   : > { %s379_s24 = scalar_lea.hbm %s574_s14, 32  ;;  %s383_s27 = scalar_lea.hbm %s618_s2, 64 }
  0x48   : > { %p380_p8 = scmp.ne.s32.totalorder %s574_s14, %s379_s24  ;;  %p384_p1 = scmp.lt.u32.totalorder %s574_s14, %s618_s2 }
  0x49   : > { %p385_p3 = scmp.lt.u32.totalorder %s383_s27, %s379_s24  ;;  %p387_p6 = scmp.lt.u32.totalorder %s379_s24, %s574_s14 }
  0x4a   : > { %p381_p9 = pnand %p380_p8, %p627_p12 }
  0x4b   : > { %p386_p11 = por %p385_p3, %p384_p1 }
  0x4c   : > { %p382_p0 = pneg %p381_p9 }
  0x4d   : > { %p388_p13 = por %p387_p6, %p386_p11 }
  0x4f   : > { %p389_p7 = pnand %p388_p13, %p382_p0 }
  0x51   : > { %392 = shalt.err (!%p389_p7)
}
  0x52   : > { %291 = dma.vmem_to_hbm [thread:$0]  (%p627_p12), %s569_s6, 32, %s574_s14, %s184_s16  }
  0x53 PF: > { %s209_s30 = sand.u32 1, %s419_s9   ;;  %p628_p10 = scmp.ne.s32.totalorder %s623_s22, 0 }
  0x54   : > { %p629_p2 = scmp.ge.s32.totalorder %s431_s12, 2  ;;  %s210_s3 = scalar_lea.sflag [#allocation4], %s209_s30 }
  0x56   : > { %p298_p4 = pnand %p629_p2, %p628_p10 }
  0x58   : > { %414 = dma.done.wait (!%p298_p4), %s210_s3, 32  }
  0x59   : > { %416 = vsyncadd (!%p298_p4), %s210_s3, 4294967264  ;;  %p15_p5 = scmp.ge.s32.totalorder %s475_s15, 4   ;;  %s630_s9 = smov %s423_s10 }
  0x5a   : > { %s631_s10 = smov %s427_s11  ;;  %s632_s11 = smov %s487_s18 }
  0x5b   : > { %s633_s12 = smov %s475_s15  ;;  %17 = sbr.rel (!%p15_p5) target bundleno = 5 (0x5), region = 76 }
  0x62   :  { %215 = vsyncpa [#allocation3], 1 }
  0x63   :  { %217 = vsyncpa [#allocation3 + $0x1], 1 }
  0x64   :  { %218 = vsyncpa [#allocation4], 1 }
  0x65   :  { %220 = vsyncpa [#allocation4 + $0x1], 1 }

</bundles_post_ra>
